<compile_context>
chip_gen: v5e
topology: v5e:2x2
jax: 0.10.0
libtpu: 0.0.40
codegen_flags: <defaults>
</compile_context>

<pallas_src>
import functools
import math

import jax
import jax.numpy as jnp
from jax.experimental import pallas as pl
from jax.experimental.pallas import tpu as pltpu


def calculate_laplacian_with_self_loop(adj):
    """D^{-1/2} (A + I) D^{-1/2}, matching the PyTorch helper."""
    a = adj + jnp.eye(adj.shape[0], dtype=adj.dtype)
    row_sum = a.sum(axis=1)
    d_inv_sqrt = jnp.power(row_sum, -0.5)
    d_inv_sqrt = jnp.where(jnp.isinf(d_inv_sqrt), 0.0, d_inv_sqrt)
    d_mat = jnp.diag(d_inv_sqrt)
    return d_mat @ a @ d_mat


def _tgcn_seq_kernel(lap_ref, x_ref,
                     w1xr_ref, w1hr_ref, w1xu_ref, w1hu_ref, br_ref, bu_ref,
                     w2x_ref, w2h_ref, b2_ref,
                     out_ref, h_ref, *, batch, num_nodes):
    """One TGCN-cell time step; grid axis 0 iterates the sequence."""
    t = pl.program_id(0)

    @pl.when(t == 0)
    def _init():
        h_ref[...] = jnp.zeros_like(h_ref)

    lap = lap_ref[...]                          # (N, N)
    x = x_ref[...].astype(jnp.float32)          # (B*N, C)
    h = h_ref[...]                              # (B*N, H) f32 carry

    def graph_conv(wx_ref, wh_ref, b_ref, feat):
        # [x | feat] @ W == x @ W_x + feat @ W_h  (narrow output first),
        # then apply the laplacian per batch element: L @ Y_b.
        y = (jnp.dot(x, wx_ref[...], preferred_element_type=jnp.float32)
             + jnp.dot(feat, wh_ref[...], preferred_element_type=jnp.float32))
        parts = []
        for b in range(batch):                  # static, unrolled
            yb = y[b * num_nodes:(b + 1) * num_nodes, :]
            parts.append(jnp.dot(lap, yb, preferred_element_type=jnp.float32))
        ly = parts[0] if batch == 1 else jnp.concatenate(parts, axis=0)
        return ly + b_ref[...]

    r = jax.nn.sigmoid(graph_conv(w1xr_ref, w1hr_ref, br_ref, h))
    u = jax.nn.sigmoid(graph_conv(w1xu_ref, w1hu_ref, bu_ref, h))
    c = jnp.tanh(graph_conv(w2x_ref, w2h_ref, b2_ref, r * h))

    h_new = u * h + (1.0 - u) * c
    h_ref[...] = h_new

    @pl.when(t == pl.num_programs(0) - 1)
    def _finalize():
        out_ref[...] = h_new.astype(out_ref.dtype)


def tgcn_forward(laplacian, w1, b1, w2, b2, inputs, hidden_dim):
    """JAX/Pallas equivalent of TGCN.forward (returns final hidden state)."""
    batch, seq_len, num_nodes, in_channels = inputs.shape
    h_dim = hidden_dim
    bn = batch * num_nodes

    # (B, S, N, C) -> (S, B*N, C): fold batch onto the sublane axis, once.
    x_seq = jnp.transpose(inputs, (1, 0, 2, 3)).reshape(seq_len, bn,
                                                        in_channels)

    # Split conv1 weight rows into [input | hidden] and columns into [r | u];
    # conv2 rows into [input | hidden].  Removes the concat entirely.
    w1x, w1h = w1[:in_channels], w1[in_channels:]
    w1x_r, w1x_u = w1x[:, :h_dim], w1x[:, h_dim:]
    w1h_r, w1h_u = w1h[:, :h_dim], w1h[:, h_dim:]
    b_r = b1[:h_dim].reshape(1, h_dim)
    b_u = b1[h_dim:].reshape(1, h_dim)
    w2x, w2h = w2[:in_channels], w2[in_channels:]
    b2r = b2.reshape(1, h_dim)

    kernel = functools.partial(_tgcn_seq_kernel, batch=batch,
                               num_nodes=num_nodes)

    const = lambda t: (0, 0)
    flops_step = (3 * (2 * bn * in_channels * h_dim + 2 * bn * h_dim * h_dim)
                  + 3 * (2 * batch * num_nodes * num_nodes * h_dim)
                  + 10 * bn * h_dim)
    cost = pl.CostEstimate(
        flops=seq_len * flops_step,
        transcendentals=seq_len * 3 * bn * h_dim,
        bytes_accessed=4 * (seq_len * bn * in_channels
                            + num_nodes * num_nodes
                            + (in_channels + h_dim) * 3 * h_dim
                            + 3 * h_dim + bn * h_dim))

    # TODO(synk): for realistic N, tile L rows / single-buffer invariants and
    # use a bf16 MXU path; at these toy sizes everything fits untiled in VMEM.
    out = pl.pallas_call(
        kernel,
        out_shape=jax.ShapeDtypeStruct((bn, h_dim), inputs.dtype),
        grid_spec=pltpu.PrefetchScalarGridSpec(
            num_scalar_prefetch=0,
            grid=(seq_len,),
            in_specs=[
                pl.BlockSpec((num_nodes, num_nodes), const),          # L
                pl.BlockSpec((pl.Squeezed(), bn, in_channels),
                             lambda t: (t, 0, 0)),                    # x_t
                pl.BlockSpec((in_channels, h_dim), const),            # W1x_r
                pl.BlockSpec((h_dim, h_dim), const),                  # W1h_r
                pl.BlockSpec((in_channels, h_dim), const),            # W1x_u
                pl.BlockSpec((h_dim, h_dim), const),                  # W1h_u
                pl.BlockSpec((1, h_dim), const),                      # b_r
                pl.BlockSpec((1, h_dim), const),                      # b_u
                pl.BlockSpec((in_channels, h_dim), const),            # W2x
                pl.BlockSpec((h_dim, h_dim), const),                  # W2h
                pl.BlockSpec((1, h_dim), const),                      # b2
            ],
            out_specs=pl.BlockSpec((bn, h_dim), const),
            scratch_shapes=[pltpu.VMEM((bn, h_dim), jnp.float32)],
        ),
        compiler_params=pltpu.CompilerParams(
            dimension_semantics=("arbitrary",)),
        cost_estimate=cost,
    )(laplacian, x_seq, w1x_r, w1h_r, w1x_u, w1h_u, b_r, b_u, w2x, w2h, b2r)

    return out.reshape(batch, num_nodes, h_dim)


def tgcn_reference(laplacian, w1, b1, w2, b2, inputs, hidden_dim):
    """Plain-JAX reference matching the PyTorch TGCN.forward."""
    batch, seq_len, num_nodes, _ = inputs.shape
    h = jnp.zeros((batch, num_nodes, hidden_dim), dtype=inputs.dtype)
    for t in range(seq_len):
        x = inputs[:, t]
        cat1 = jnp.concatenate([x, h], axis=2)
        ru = jax.nn.sigmoid(jnp.matmul(laplacian, cat1) @ w1 + b1)
        r, u = ru[..., :hidden_dim], ru[..., hidden_dim:]
        cat2 = jnp.concatenate([x, r * h], axis=2)
        c = jnp.tanh(jnp.matmul(laplacian, cat2) @ w2 + b2)
        h = u * h + (1.0 - u) * c
    return h


def xavier_uniform(key, shape, dtype=jnp.float32):
    fan_in, fan_out = shape
    limit = math.sqrt(6.0 / (fan_in + fan_out))
    return jax.random.uniform(key, shape, dtype, minval=-limit, maxval=limit)


if __name__ == "__main__":
    batch_size = 2
    seq_len = 8
    num_nodes = 16
    in_channels = 4
    hidden_dim = 32

    key = jax.random.PRNGKey(0)
    k_adj, k_w1, k_w2, k_in = jax.random.split(key, 4)

    # Symmetric random adjacency (the buffer handed to the module).
    adj_raw = jax.random.uniform(k_adj, (num_nodes, num_nodes),
                                 dtype=jnp.float32)
    adj = 0.5 * (adj_raw + adj_raw.T)
    laplacian = calculate_laplacian_with_self_loop(adj)

    # Parameters matching reset_parameters(): xavier weights, constant bias
    # (graph_conv1 bias=1.0, graph_conv2 bias=0.0).
    w1 = xavier_uniform(k_w1, (in_channels + hidden_dim, 2 * hidden_dim))
    b1 = jnp.full((2 * hidden_dim,), 1.0, dtype=jnp.float32)
    w2 = xavier_uniform(k_w2, (in_channels + hidden_dim, hidden_dim))
    b2 = jnp.zeros((hidden_dim,), dtype=jnp.float32)

    inputs = jax.random.normal(
        k_in, (batch_size, seq_len, num_nodes, in_channels),
        dtype=jnp.float32)

    out = tgcn_forward(laplacian, w1, b1, w2, b2, inputs, hidden_dim)
    jax.block_until_ready(out)

    ref = tgcn_reference(laplacian, w1, b1, w2, b2, inputs, hidden_dim)
    assert out.shape == (batch_size, num_nodes, hidden_dim)
    assert jnp.allclose(out, ref, atol=1e-4, rtol=1e-4), (
        float(jnp.max(jnp.abs(out - ref))))

    print("KERNEL_OK")
</pallas_src>

<mosaic_0001>
module attributes {stable_mosaic.version = 11 : i64} {
  func.func @_tgcn_seq_kernel(%arg0: i32, %arg1: memref<16x16xf32, #tpu.memory_space<vmem>>, %arg2: memref<1x32x4xf32, #tpu.memory_space<vmem>>, %arg3: memref<4x32xf32, #tpu.memory_space<vmem>>, %arg4: memref<32x32xf32, #tpu.memory_space<vmem>>, %arg5: memref<4x32xf32, #tpu.memory_space<vmem>>, %arg6: memref<32x32xf32, #tpu.memory_space<vmem>>, %arg7: memref<1x32xf32, #tpu.memory_space<vmem>>, %arg8: memref<1x32xf32, #tpu.memory_space<vmem>>, %arg9: memref<4x32xf32, #tpu.memory_space<vmem>>, %arg10: memref<32x32xf32, #tpu.memory_space<vmem>>, %arg11: memref<1x32xf32, #tpu.memory_space<vmem>>, %arg12: memref<32x32xf32, #tpu.memory_space<vmem>>, %arg13: memref<32x32xf32, #tpu.memory_space<vmem>>) attributes {dimension_semantics = [#tpu.dimension_semantics<arbitrary>], iteration_bounds = array<i64: 8>, scalar_prefetch = 0 : i64, scratch_operands = 1 : i64, tpu.core_type = #tpu.core_type<tc>, window_params = [{pipeline_mode = #tpu.pipeline_mode<synchronous>, transform_indices = @transform_0, window_bounds = array<i64: 16, 16>}, {transform_indices = @transform_1, window_bounds = array<i64: 1, 32, 4>}, {pipeline_mode = #tpu.pipeline_mode<synchronous>, transform_indices = @transform_2, window_bounds = array<i64: 4, 32>}, {pipeline_mode = #tpu.pipeline_mode<synchronous>, transform_indices = @transform_3, window_bounds = array<i64: 32, 32>}, {pipeline_mode = #tpu.pipeline_mode<synchronous>, transform_indices = @transform_4, window_bounds = array<i64: 4, 32>}, {pipeline_mode = #tpu.pipeline_mode<synchronous>, transform_indices = @transform_5, window_bounds = array<i64: 32, 32>}, {pipeline_mode = #tpu.pipeline_mode<synchronous>, transform_indices = @transform_6, window_bounds = array<i64: 1, 32>}, {pipeline_mode = #tpu.pipeline_mode<synchronous>, transform_indices = @transform_7, window_bounds = array<i64: 1, 32>}, {pipeline_mode = #tpu.pipeline_mode<synchronous>, transform_indices = @transform_8, window_bounds = array<i64: 4, 32>}, {pipeline_mode = #tpu.pipeline_mode<synchronous>, transform_indices = @transform_9, window_bounds = array<i64: 32, 32>}, {pipeline_mode = #tpu.pipeline_mode<synchronous>, transform_indices = @transform_10, window_bounds = array<i64: 1, 32>}, {pipeline_mode = #tpu.pipeline_mode<synchronous>, transform_indices = @transform_11, window_bounds = array<i64: 32, 32>}]} {
    %c0_i32 = arith.constant 0 : i32
    %0 = arith.cmpi eq, %arg0, %c0_i32 : i32
    %1 = arith.extui %0 : i1 to i32
    %c0_i32_0 = arith.constant 0 : i32
    %2 = arith.cmpi ne, %1, %c0_i32_0 : i32
    scf.if %2 {
      %cst_42 = arith.constant 0.000000e+00 : f32
      %67 = vector.broadcast %cst_42 : f32 to vector<32x32xf32>
      %c0_43 = arith.constant 0 : index
      %c0_44 = arith.constant 0 : index
      %68 = vector.load %arg13[%c0_43, %c0_44] : memref<32x32xf32, #tpu.memory_space<vmem>>, vector<32x32xf32>
      tpu.vector_store %arg13[%c0_43, %c0_44], %67 {strides = array<i32>} : memref<32x32xf32, #tpu.memory_space<vmem>>, vector<32x32xf32>,
    } else {
    }
    %c0 = arith.constant 0 : index
    %c0_1 = arith.constant 0 : index
    %3 = vector.load %arg1[%c0, %c0_1] : memref<16x16xf32, #tpu.memory_space<vmem>>, vector<16x16xf32>
    %c0_2 = arith.constant 0 : index
    %c0_3 = arith.constant 0 : index
    %c0_4 = arith.constant 0 : index
    %4 = vector.load %arg2[%c0_2, %c0_3, %c0_4] : memref<1x32x4xf32, #tpu.memory_space<vmem>>, vector<1x32x4xf32>
    %5 = vector.shape_cast %4 : vector<1x32x4xf32> to vector<32x4xf32>
    %c0_5 = arith.constant 0 : index
    %c0_6 = arith.constant 0 : index
    %6 = vector.load %arg13[%c0_5, %c0_6] : memref<32x32xf32, #tpu.memory_space<vmem>>, vector<32x32xf32>
    %c0_7 = arith.constant 0 : index
    %c0_8 = arith.constant 0 : index
    %7 = vector.load %arg3[%c0_7, %c0_8] : memref<4x32xf32, #tpu.memory_space<vmem>>, vector<4x32xf32>
    %cst = arith.constant dense<0.000000e+00> : vector<32x32xf32>
    %8 = tpu.matmul %5, %7, %cst {dimension_numbers = #tpu.dot_dimension_numbers<[1], [0], [0], [1], [0, 0, 1, 1], [], []>} : vector<32x4xf32>, vector<4x32xf32>, vector<32x32xf32> -> vector<32x32xf32>
    %c0_9 = arith.constant 0 : index
    %c0_10 = arith.constant 0 : index
    %9 = vector.load %arg4[%c0_9, %c0_10] : memref<32x32xf32, #tpu.memory_space<vmem>>, vector<32x32xf32>
    %cst_11 = arith.constant dense<0.000000e+00> : vector<32x32xf32>
    %10 = tpu.matmul %6, %9, %cst_11 {dimension_numbers = #tpu.dot_dimension_numbers<[1], [0], [0], [1], [0, 0, 1, 1], [], []>} : vector<32x32xf32>, vector<32x32xf32>, vector<32x32xf32> -> vector<32x32xf32>
    %11 = arith.addf %8, %10 : vector<32x32xf32>
    %12 = vector.extract_strided_slice %11 {offsets = [0, 0], sizes = [16, 32], strides = [1, 1]} : vector<32x32xf32> to vector<16x32xf32>
    %cst_12 = arith.constant dense<0.000000e+00> : vector<16x32xf32>
    %13 = tpu.matmul %3, %12, %cst_12 {dimension_numbers = #tpu.dot_dimension_numbers<[1], [0], [0], [1], [0, 0, 1, 1], [], []>} : vector<16x16xf32>, vector<16x32xf32>, vector<16x32xf32> -> vector<16x32xf32>
    %14 = vector.extract_strided_slice %11 {offsets = [16, 0], sizes = [16, 32], strides = [1, 1]} : vector<32x32xf32> to vector<16x32xf32>
    %cst_13 = arith.constant dense<0.000000e+00> : vector<16x32xf32>
    %15 = tpu.matmul %3, %14, %cst_13 {dimension_numbers = #tpu.dot_dimension_numbers<[1], [0], [0], [1], [0, 0, 1, 1], [], []>} : vector<16x16xf32>, vector<16x32xf32>, vector<16x32xf32> -> vector<16x32xf32>
    %16 = tpu.concatenate %13, %15 in 0 : vector<16x32xf32>, vector<16x32xf32> -> vector<32x32xf32>
    %c0_14 = arith.constant 0 : index
    %c0_15 = arith.constant 0 : index
    %17 = vector.load %arg7[%c0_14, %c0_15] : memref<1x32xf32, #tpu.memory_space<vmem>>, vector<1x32xf32>
    %18 = vector.broadcast %17 : vector<1x32xf32> to vector<32x32xf32>
    %19 = arith.addf %16, %18 : vector<32x32xf32>
    %20 = arith.negf %19 : vector<32x32xf32>
    %21 = math.exp %20 : vector<32x32xf32>
    %cst_16 = arith.constant 1.000000e+00 : f32
    %22 = vector.broadcast %cst_16 : f32 to vector<32x32xf32>
    %23 = arith.addf %22, %21 : vector<32x32xf32>
    %24 = arith.divf %22, %23 : vector<32x32xf32>
    %c0_17 = arith.constant 0 : index
    %c0_18 = arith.constant 0 : index
    %25 = vector.load %arg5[%c0_17, %c0_18] : memref<4x32xf32, #tpu.memory_space<vmem>>, vector<4x32xf32>
    %cst_19 = arith.constant dense<0.000000e+00> : vector<32x32xf32>
    %26 = tpu.matmul %5, %25, %cst_19 {dimension_numbers = #tpu.dot_dimension_numbers<[1], [0], [0], [1], [0, 0, 1, 1], [], []>} : vector<32x4xf32>, vector<4x32xf32>, vector<32x32xf32> -> vector<32x32xf32>
    %c0_20 = arith.constant 0 : index
    %c0_21 = arith.constant 0 : index
    %27 = vector.load %arg6[%c0_20, %c0_21] : memref<32x32xf32, #tpu.memory_space<vmem>>, vector<32x32xf32>
    %cst_22 = arith.constant dense<0.000000e+00> : vector<32x32xf32>
    %28 = tpu.matmul %6, %27, %cst_22 {dimension_numbers = #tpu.dot_dimension_numbers<[1], [0], [0], [1], [0, 0, 1, 1], [], []>} : vector<32x32xf32>, vector<32x32xf32>, vector<32x32xf32> -> vector<32x32xf32>
    %29 = arith.addf %26, %28 : vector<32x32xf32>
    %30 = vector.extract_strided_slice %29 {offsets = [0, 0], sizes = [16, 32], strides = [1, 1]} : vector<32x32xf32> to vector<16x32xf32>
    %cst_23 = arith.constant dense<0.000000e+00> : vector<16x32xf32>
    %31 = tpu.matmul %3, %30, %cst_23 {dimension_numbers = #tpu.dot_dimension_numbers<[1], [0], [0], [1], [0, 0, 1, 1], [], []>} : vector<16x16xf32>, vector<16x32xf32>, vector<16x32xf32> -> vector<16x32xf32>
    %32 = vector.extract_strided_slice %29 {offsets = [16, 0], sizes = [16, 32], strides = [1, 1]} : vector<32x32xf32> to vector<16x32xf32>
    %cst_24 = arith.constant dense<0.000000e+00> : vector<16x32xf32>
    %33 = tpu.matmul %3, %32, %cst_24 {dimension_numbers = #tpu.dot_dimension_numbers<[1], [0], [0], [1], [0, 0, 1, 1], [], []>} : vector<16x16xf32>, vector<16x32xf32>, vector<16x32xf32> -> vector<16x32xf32>
    %34 = tpu.concatenate %31, %33 in 0 : vector<16x32xf32>, vector<16x32xf32> -> vector<32x32xf32>
    %c0_25 = arith.constant 0 : index
    %c0_26 = arith.constant 0 : index
    %35 = vector.load %arg8[%c0_25, %c0_26] : memref<1x32xf32, #tpu.memory_space<vmem>>, vector<1x32xf32>
    %36 = vector.broadcast %35 : vector<1x32xf32> to vector<32x32xf32>
    %37 = arith.addf %34, %36 : vector<32x32xf32>
    %38 = arith.negf %37 : vector<32x32xf32>
    %39 = math.exp %38 : vector<32x32xf32>
    %cst_27 = arith.constant 1.000000e+00 : f32
    %40 = vector.broadcast %cst_27 : f32 to vector<32x32xf32>
    %41 = arith.addf %40, %39 : vector<32x32xf32>
    %42 = arith.divf %40, %41 : vector<32x32xf32>
    %43 = arith.mulf %24, %6 : vector<32x32xf32>
    %c0_28 = arith.constant 0 : index
    %c0_29 = arith.constant 0 : index
    %44 = vector.load %arg9[%c0_28, %c0_29] : memref<4x32xf32, #tpu.memory_space<vmem>>, vector<4x32xf32>
    %cst_30 = arith.constant dense<0.000000e+00> : vector<32x32xf32>
    %45 = tpu.matmul %5, %44, %cst_30 {dimension_numbers = #tpu.dot_dimension_numbers<[1], [0], [0], [1], [0, 0, 1, 1], [], []>} : vector<32x4xf32>, vector<4x32xf32>, vector<32x32xf32> -> vector<32x32xf32>
    %c0_31 = arith.constant 0 : index
    %c0_32 = arith.constant 0 : index
    %46 = vector.load %arg10[%c0_31, %c0_32] : memref<32x32xf32, #tpu.memory_space<vmem>>, vector<32x32xf32>
    %cst_33 = arith.constant dense<0.000000e+00> : vector<32x32xf32>
    %47 = tpu.matmul %43, %46, %cst_33 {dimension_numbers = #tpu.dot_dimension_numbers<[1], [0], [0], [1], [0, 0, 1, 1], [], []>} : vector<32x32xf32>, vector<32x32xf32>, vector<32x32xf32> -> vector<32x32xf32>
    %48 = arith.addf %45, %47 : vector<32x32xf32>
    %49 = vector.extract_strided_slice %48 {offsets = [0, 0], sizes = [16, 32], strides = [1, 1]} : vector<32x32xf32> to vector<16x32xf32>
    %cst_34 = arith.constant dense<0.000000e+00> : vector<16x32xf32>
    %50 = tpu.matmul %3, %49, %cst_34 {dimension_numbers = #tpu.dot_dimension_numbers<[1], [0], [0], [1], [0, 0, 1, 1], [], []>} : vector<16x16xf32>, vector<16x32xf32>, vector<16x32xf32> -> vector<16x32xf32>
    %51 = vector.extract_strided_slice %48 {offsets = [16, 0], sizes = [16, 32], strides = [1, 1]} : vector<32x32xf32> to vector<16x32xf32>
    %cst_35 = arith.constant dense<0.000000e+00> : vector<16x32xf32>
    %52 = tpu.matmul %3, %51, %cst_35 {dimension_numbers = #tpu.dot_dimension_numbers<[1], [0], [0], [1], [0, 0, 1, 1], [], []>} : vector<16x16xf32>, vector<16x32xf32>, vector<16x32xf32> -> vector<16x32xf32>
    %53 = tpu.concatenate %50, %52 in 0 : vector<16x32xf32>, vector<16x32xf32> -> vector<32x32xf32>
    %c0_36 = arith.constant 0 : index
    %c0_37 = arith.constant 0 : index
    %54 = vector.load %arg11[%c0_36, %c0_37] : memref<1x32xf32, #tpu.memory_space<vmem>>, vector<1x32xf32>
    %55 = vector.broadcast %54 : vector<1x32xf32> to vector<32x32xf32>
    %56 = arith.addf %53, %55 : vector<32x32xf32>
    %57 = math.tanh %56 : vector<32x32xf32>
    %58 = arith.mulf %42, %6 : vector<32x32xf32>
    %cst_38 = arith.constant 1.000000e+00 : f32
    %59 = vector.broadcast %cst_38 : f32 to vector<32x32xf32>
    %60 = arith.subf %59, %42 : vector<32x32xf32>
    %61 = arith.mulf %60, %57 : vector<32x32xf32>
    %62 = arith.addf %58, %61 : vector<32x32xf32>
    %c0_39 = arith.constant 0 : index
    %c0_40 = arith.constant 0 : index
    %63 = vector.load %arg13[%c0_39, %c0_40] : memref<32x32xf32, #tpu.memory_space<vmem>>, vector<32x32xf32>
    tpu.vector_store %arg13[%c0_39, %c0_40], %62 {strides = array<i32>} : memref<32x32xf32, #tpu.memory_space<vmem>>, vector<32x32xf32>,
    %c7_i32 = arith.constant 7 : i32
    %64 = arith.cmpi eq, %arg0, %c7_i32 : i32
    %65 = arith.extui %64 : i1 to i32
    %c0_i32_41 = arith.constant 0 : i32
    %66 = arith.cmpi ne, %65, %c0_i32_41 : i32
    scf.if %66 {
      %c0_42 = arith.constant 0 : index
      %c0_43 = arith.constant 0 : index
      %67 = vector.load %arg12[%c0_42, %c0_43] : memref<32x32xf32, #tpu.memory_space<vmem>>, vector<32x32xf32>
      tpu.vector_store %arg12[%c0_42, %c0_43], %62 {strides = array<i32>} : memref<32x32xf32, #tpu.memory_space<vmem>>, vector<32x32xf32>,
    } else {
    }
    return
  }
  func.func @transform_0(%arg0: i32) -> (i32, i32) {
    %c0_i32 = arith.constant 0 : i32
    %c0_i32_0 = arith.constant 0 : i32
    %c0_i32_1 = arith.constant 0 : i32
    return %c0_i32, %c0_i32_0 : i32, i32
  }
  func.func @transform_1(%arg0: i32) -> (i32, i32, i32) {
    %c0_i32 = arith.constant 0 : i32
    %c0_i32_0 = arith.constant 0 : i32
    %c0_i32_1 = arith.constant 0 : i32
    return %arg0, %c0_i32, %c0_i32_0 : i32, i32, i32
  }
  func.func @transform_2(%arg0: i32) -> (i32, i32) {
    %c0_i32 = arith.constant 0 : i32
    %c0_i32_0 = arith.constant 0 : i32
    %c0_i32_1 = arith.constant 0 : i32
    return %c0_i32, %c0_i32_0 : i32, i32
  }
  func.func @transform_3(%arg0: i32) -> (i32, i32) {
    %c0_i32 = arith.constant 0 : i32
    %c0_i32_0 = arith.constant 0 : i32
    %c0_i32_1 = arith.constant 0 : i32
    return %c0_i32, %c0_i32_0 : i32, i32
  }
  func.func @transform_4(%arg0: i32) -> (i32, i32) {
    %c0_i32 = arith.constant 0 : i32
    %c0_i32_0 = arith.constant 0 : i32
    %c0_i32_1 = arith.constant 0 : i32
    return %c0_i32, %c0_i32_0 : i32, i32
  }
  func.func @transform_5(%arg0: i32) -> (i32, i32) {
    %c0_i32 = arith.constant 0 : i32
    %c0_i32_0 = arith.constant 0 : i32
    %c0_i32_1 = arith.constant 0 : i32
    return %c0_i32, %c0_i32_0 : i32, i32
  }
  func.func @transform_6(%arg0: i32) -> (i32, i32) {
    %c0_i32 = arith.constant 0 : i32
    %c0_i32_0 = arith.constant 0 : i32
    %c0_i32_1 = arith.constant 0 : i32
    return %c0_i32, %c0_i32_0 : i32, i32
  }
  func.func @transform_7(%arg0: i32) -> (i32, i32) {
    %c0_i32 = arith.constant 0 : i32
    %c0_i32_0 = arith.constant 0 : i32
    %c0_i32_1 = arith.constant 0 : i32
    return %c0_i32, %c0_i32_0 : i32, i32
  }
  func.func @transform_8(%arg0: i32) -> (i32, i32) {
    %c0_i32 = arith.constant 0 : i32
    %c0_i32_0 = arith.constant 0 : i32
    %c0_i32_1 = arith.constant 0 : i32
    return %c0_i32, %c0_i32_0 : i32, i32
  }
  func.func @transform_9(%arg0: i32) -> (i32, i32) {
    %c0_i32 = arith.constant 0 : i32
    %c0_i32_0 = arith.constant 0 : i32
    %c0_i32_1 = arith.constant 0 : i32
    return %c0_i32, %c0_i32_0 : i32, i32
  }
  func.func @transform_10(%arg0: i32) -> (i32, i32) {
    %c0_i32 = arith.constant 0 : i32
    %c0_i32_0 = arith.constant 0 : i32
    %c0_i32_1 = arith.constant 0 : i32
    return %c0_i32, %c0_i32_0 : i32, i32
  }
  func.func @transform_11(%arg0: i32) -> (i32, i32) {
    %c0_i32 = arith.constant 0 : i32
    %c0_i32_0 = arith.constant 0 : i32
    %c0_i32_1 = arith.constant 0 : i32
    return %c0_i32, %c0_i32_0 : i32, i32
  }
}

</mosaic_0001>

<bundles_post_ra>
// kernel: tpu_custom_call.1
= control target key start
LH: loop header
LB: loop body
LE: loop exit
PB: predicated region body
PF: predicated region fallthrough
CT: control target
= control target key end

     0   :  { %16 = vsyncpa [#allocation4], 0  ;;  %s1265_s17 = smov 0   ;;  %s1550_s0 = inlined_call_operand.vmem [shape: f32[16,16], index: 0, kind: input, shape index: {}]   ;;  %s1551_s1 = inlined_call_operand.vmem [shape: f32[8,32,4], index: 1, kind: input, shape index: {}]   ;;  %s1552_s2 = inlined_call_operand.vmem [shape: f32[4,32], index: 2, kind: input, shape index: {}]   ;;  %s1553_s3 = inlined_call_operand.vmem [shape: f32[32,32], index: 3, kind: input, shape index: {}]   ;;  %s1554_s4 = inlined_call_operand.vmem [shape: f32[4,32], index: 4, kind: input, shape index: {}]   ;;  %s1555_s5 = inlined_call_operand.vmem [shape: f32[32,32], index: 5, kind: input, shape index: {}]   ;;  %s1556_s6 = inlined_call_operand.vmem [shape: f32[1,32], index: 6, kind: input, shape index: {}]   ;;  %s1557_s7 = inlined_call_operand.vmem [shape: f32[1,32], index: 7, kind: input, shape index: {}]   ;;  %s1558_s8 = inlined_call_operand.vmem [shape: f32[4,32], index: 8, kind: input, shape index: {}]   ;;  %s1559_s9 = inlined_call_operand.vmem [shape: f32[32,32], index: 9, kind: input, shape index: {}]   ;;  %s1560_s10 = inlined_call_operand.vmem [shape: f32[1,32], index: 10, kind: input, shape index: {}]   ;;  %s1561_s11 = inlined_call_operand.hbm [shape: f32[32,32], index: 11, kind: output, shape index: {}]  }
   0x1 LB: > { %s1271_s18 = sadd.s32 4294967295, %s1199_s17   ;;  %p1039_p0 = scmp.ge.s32.totalorder %s1199_s17, 1  ;;  %s1199_s17 = sphi %s1265_s17, %s22_s17  }
   0x2   : > { %p333_p1 = scmp.lt.s32.totalorder %s1199_s17, 9 }
   0x4   : > { %p334_p2 = pnand %p1039_p0, %p333_p1 }
   0x5   : > { %p368_p3 = scmp.lt.s32.totalorder (!%p334_p2), %s1271_s18, 7  ;;  %p1042_p4 = scmp.ne.s32.totalorder (!%p334_p2), %s1271_s18, 0 }
   0x6   : > { %337 = sbr.rel (%p334_p2) target bundleno = 667 (0x29b), region = 64 }
   0xb   : > { %s369_s19 = scalar_select %p368_p3, %s1271_s18, 7 }
   0xc   : > { %376 = sbr.rel (%p1042_p4) target bundleno = 22 (0x16), region = 68 }
   0xd   : > { %s1095_s20 = sshll.u32 %s369_s19, 5 }
   0xe   : > { %s1280_s23 = scalar_lea.vmem %s1551_s1, %s1095_s20 }
  0x11   : > { %vm377_vm0 = vcmask 261120   ;;  %v1201_v0 = vmov 0.0  }
  0x12   : > { %378 = vst.msk [vmem:[#allocation2] sm:$0xff] %vm377_vm0, %v1201_v0 }
  0x13   : > { %379 = vst.msk [vmem:[#allocation2 + $0x8] sm:$0xff] %vm377_vm0, %v1201_v0 }
  0x14   : > { %380 = vst.msk [vmem:[#allocation2 + $0x10] sm:$0xff] %vm377_vm0, %v1201_v0 }
  0x15   : > { %381 = vst.msk [vmem:[#allocation2 + $0x18] sm:$0xff] %vm377_vm0, %v1201_v0 }
  0x16 PF: > { %v396_v1 = vld [vmem:[%s1553_s3 + $0x18] sm:$0xff]  ;;  %v395_v2 = vld [vmem:[%s1553_s3 + $0x10] sm:$0xff]  ;;  %vm452_vm1 = vcmask 1043456   ;;  %vm439_vm2 = vcmask 31744   ;;  %v392_v3 = vld [vmem:[%s1552_s2] sm:$0xf] }
  0x17   : > { %422 = vmatpush.msra.mxu0 %v396_v1  ;;  %v394_v4 = vld [vmem:[%s1553_s3 + $0x8] sm:$0xff]  ;;  %1047 = vmatpush.msk.msra.mxu1 %vm452_vm1, %v392_v3  ;;  %v1297_v5 = vld [vmem:[%s1280_s23] sm:$0xff]  ;;  %vm397_vm3 = vcmask 261120   ;;  %v1318_v10 = vld [vmem:[%s1280_s23 + $0x10] sm:$0xff]  ;;  %vm485_vm4 = vcmask 130048   ;;  %p1090_p5 = scmp.ne.s32.totalorder %s1271_s18, 7 }
  0x18   : > { %1048 = vmatmul.msk.f32.vlgmr.msra.gmra.mxu1 %vm439_vm2, %v1297_v5  ;;  %v393_v6 = vld [vmem:[%s1553_s3] sm:$0xff]  ;;  %v1309_v8 = vld [vmem:[%s1280_s23 + $0x8] sm:$0xff]  ;;  %v1327_v12 = vld [vmem:[%s1280_s23 + $0x18] sm:$0xff] }
  0x19   : > { %423 = vmatpush.msra.mxu0 %v395_v2  ;;  %v1304_v7 = vld [vmem:[#allocation2] sm:$0xff]  ;;  %v1338_v20 = vld [vmem:[%s1550_s0 + $0x8] sm:$0xff]  ;;  %v626_v23 = vld [vmem:[%s1555_s5 + $0x18] sm:$0xff] }
  0x1a   : > { %v1313_v9 = vld [vmem:[#allocation2 + $0x8] sm:$0xff]  ;;  %v1343_v21 = vld [vmem:[%s1550_s0] sm:$0xff]  ;;  %v625_v24 = vld [vmem:[%s1555_s5 + $0x10] sm:$0xff] }
  0x1b   : > { %424 = vmatpush.msra.mxu0 %v394_v4  ;;  %v1322_v11 = vld [vmem:[#allocation2 + $0x10] sm:$0xff]  ;;  %v624_v26 = vld [vmem:[%s1555_s5 + $0x8] sm:$0xff]  ;;  %v623_v27 = vld [vmem:[%s1555_s5] sm:$0xff] }
  0x1c   : > { %v1331_v13 = vld [vmem:[#allocation2 + $0x18] sm:$0xff]  ;;  %v622_v32 = vld [vmem:[%s1554_s4] sm:$0xf] }
  0x1d   : > { %425 = vmatpush.msra.mxu0 %v393_v6  ;;  %v1118_v33 = vld [vmem:[%s1556_s6] ss:$0 sm:$0xff] }
  0x1e   : > { %1043 = vmatmul.msk.f32.vlgmr.msra.gmra.mxu0 %vm397_vm3, %v1304_v7  ;;  %v822_v40 = vld [vmem:[%s1558_s8] sm:$0xf] }
  0x20   : > { %1049 = vmatmul.msk.f32.gmra.mxu1 %vm439_vm2, %v1309_v8 }
  0x26   : > { %1044 = vmatmul.msk.f32.gmra.mxu0 %vm397_vm3, %v1313_v9 }
  0x28   : > { %1050 = vmatmul.msk.f32.gmra.mxu1 %vm439_vm2, %v1318_v10 }
  0x2e   : > { %1045 = vmatmul.msk.f32.gmra.mxu0 %vm397_vm3, %v1322_v11 }
  0x30   : > { %1051 = vmatmul.msk.f32.gmra.mxu1 %vm439_vm2, %v1327_v12 }
  0x36   : > { %1046 = vmatmul.msk.f32.gmra.mxu0 %vm397_vm3, %v1331_v13 }
  0x95   : > { %v473_v14 = vpop.f32.mrf.mxu1 }
  0x9b   : > { %v427_v15 = vpop.f32.mrf.mxu0 }
  0x9c   : > { %v474_v19 = vadd.f32 %v473_v14, %v427_v15 }
  0x9d   : > { %v476_v16 = vpop.f32.mrf.mxu1 }
  0xa3   : > { %v430_v17 = vpop.f32.mrf.mxu0 }
  0xa4   : > { %v477_v18 = vadd.f32 %v476_v16, %v430_v17  ;;  %v825_v16 = vld [vmem:[%s1559_s9 + $0x10] sm:$0xff] }
  0xa5   : > { %v479_v22 = vpop.f32.mrf.mxu1 }
  0xa6   : > { %506 = vmatpush.msra.mxu2 %v477_v18  ;;  %1096 = vmatpush.msra.mxu3 %v477_v18 }
  0xa8   : > { %507 = vmatpush.msra.mxu2 %v474_v19  ;;  %1097 = vmatpush.msra.mxu3 %v474_v19 }
  0xa9   : > { %1053 = vmatmul.msk.f32.vlgmr.msra.gmra.mxu3 %vm485_vm4, %v1338_v20  ;;  %1052 = vmatmul.msk.f32.vlgmr.msra.gmra.mxu2 %vm485_vm4, %v1343_v21 }
  0xaa   : > { %639 = vmatpush.msrb.mxu2 %v626_v23 }
  0xab   : > { %v433_v25 = vpop.f32.mrf.mxu0 }
  0xac   : > { %640 = vmatpush.msrb.mxu2 %v625_v24  ;;  %v480_v31 = vadd.f32 %v479_v22, %v433_v25  ;;  %v824_v22 = vld [vmem:[%s1559_s9 + $0x8] sm:$0xff]  ;;  %v823_v25 = vld [vmem:[%s1559_s9] sm:$0xff] }
  0xad   : > { %v482_v28 = vpop.f32.mrf.mxu1 }
  0xae   : > { %641 = vmatpush.msrb.mxu2 %v624_v26 }
  0xb0   : > { %642 = vmatpush.msrb.mxu2 %v623_v27 }
  0xb1   : > { %1060 = vmatmul.msk.f32.vlgmr.msrb.gmra.mxu2 %vm397_vm3, %v1304_v7 }
  0xb2   : > { %1081 = vmatpush.msk.msra.mxu2 %vm452_vm1, %v822_v40 }
  0xb3   : > { %v436_v29 = vpop.f32.mrf.mxu0 }
  0xb4   : > { %v483_v30 = vadd.f32 %v482_v28, %v436_v29 }
  0xb6   : > { %529 = vmatpush.msrb.mxu3 %v483_v30 }
  0xb8   : > { %530 = vmatpush.msrb.mxu3 %v480_v31 }
  0xb9   : > { %1054 = vmatmul.msk.f32.vlgmr.msrb.gmra.mxu3 %vm485_vm4, %v1343_v21  ;;  %1061 = vmatmul.msk.f32.gmra.mxu2 %vm397_vm3, %v1313_v9 }
  0xba   : > { %1064 = vmatpush.msk.msra.mxu3 %vm452_vm1, %v622_v32 }
  0xc1   : > { %1055 = vmatmul.msk.f32.gmra.mxu3 %vm485_vm4, %v1338_v20  ;;  %1062 = vmatmul.msk.f32.gmra.mxu2 %vm397_vm3, %v1322_v11 }
  0xc9   : > { %1065 = vmatmul.msk.f32.vlgmr.msra.gmra.mxu3 %vm439_vm2, %v1297_v5  ;;  %1063 = vmatmul.msk.f32.gmra.mxu2 %vm397_vm3, %v1331_v13 }
  0xd1   : > { %1066 = vmatmul.msk.f32.gmra.mxu3 %vm439_vm2, %v1309_v8  ;;  %1082 = vmatmul.msk.f32.vlgmr.msra.gmra.mxu2 %vm439_vm2, %v1297_v5 }
  0xd9   : > { %1067 = vmatmul.msk.f32.gmra.mxu3 %vm439_vm2, %v1318_v10  ;;  %1083 = vmatmul.msk.f32.gmra.mxu2 %vm439_vm2, %v1309_v8 }
  0xe1   : > { %1068 = vmatmul.msk.f32.gmra.mxu3 %vm439_vm2, %v1327_v12  ;;  %1084 = vmatmul.msk.f32.gmra.mxu2 %vm439_vm2, %v1318_v10 }
  0xe9   : > { %1085 = vmatmul.msk.f32.gmra.mxu2 %vm439_vm2, %v1327_v12  ;;  %v826_v12 = vld [vmem:[%s1559_s9 + $0x18] sm:$0xff] }
 0x12c   : > { %v509_v34 = vpop.f32.mrf.mxu2  ;;  %v512_v37 = vpop.f32.mrf.mxu3 }
 0x12d   : > { %v542_v35 = vadd.f32 %v1118_v33, %v509_v34  ;;  %v543_v38 = vadd.f32 %v1118_v33, %v512_v37 }
 0x12f   : > { %v1056_v36 = vmul.f32 -1.442695, %v542_v35  ;;  %v1057_v39 = vmul.f32 -1.442695, %v543_v38 }
 0x131   : > { %1121 = vpow2.f32 %v1056_v36 }
 0x132   : > { %1123 = vpow2.f32 %v1057_v39 }
 0x134   : > { %v644_v52 = vpop.f32.mrf.mxu2 }
 0x137   : > { %v1122_v41 = vpop.eup %1121 }
 0x138   : > { %v558_v43 = vadd.f32 1.0, %v1122_v41  ;;  %v1124_v46 = vpop.eup %1123 }
 0x139   : > { %v1396_v48 = vadd.f32 1.0, %v1124_v46 }
 0x13a   : > { %1125 = vrcp.f32 %v558_v43  ;;  %vm567_vm5 = vweird.f32 %v558_v43  ;;  %v573_v0 = vand.u32 2147483648, %v558_v43  ;;  %v571_v4 = vand.u32 2147483647, %v558_v43 }
 0x13b   : > { %vm582_vm9 = vweird.f32 %v1396_v48  ;;  %v588_v29 = vand.u32 2147483648, %v1396_v48  ;;  %v586_v31 = vand.u32 2147483647, %v1396_v48 }
 0x13c   : > { %v532_v42 = vpop.f32.mrf.mxu3  ;;  %v647_v62 = vpop.f32.mrf.mxu2  ;;  %v574_v14 = vor.u32 1.1754944e-38, %v573_v0  ;;  %vm572_vm8 = vcmp.eq.f32.partialorder %v571_v4, 8.507059e+37 }
 0x13d   : > { %v544_v44 = vadd.f32 %v1118_v33, %v532_v42  ;;  %v589_v36 = vor.u32 1.1754944e-38, %v588_v29  ;;  %vm587_vm12 = vcmp.eq.f32.partialorder %v586_v31, 8.507059e+37 }
 0x13f   : > { %v1058_v45 = vmul.f32 -1.442695, %v544_v44 }
 0x140   : > { %v1126_v50 = vpop.eup %1125 }
 0x141   : > { %1127 = vpow2.f32 %v1058_v45  ;;  %v563_v54 = vmul.f32 %v1126_v50, %v558_v43  ;;  %vm568_vm6 = vweird.f32 %v1126_v50 }
 0x142   : > { %1129 = vrcp.f32 %v1396_v48  ;;  %vm1411_vm7 = vmor %vm567_vm5, %vm568_vm6 }
 0x143   : > { %v564_v57 = vsub.f32 1.0, %v563_v54 }
 0x144   : > { %v535_v47 = vpop.f32.mrf.mxu3  ;;  %v650_v19 = vpop.f32.mrf.mxu2 }
 0x145   : > { %v545_v49 = vadd.f32 %v1118_v33, %v535_v47  ;;  %v565_v61 = vmul.f32 %v1126_v50, %v564_v57 }
 0x147   : > { %v1059_v51 = vmul.f32 -1.442695, %v545_v49  ;;  %v1128_v53 = vpop.eup %1127  ;;  %v566_v3 = vadd.f32 %v1126_v50, %v565_v61 }
 0x148   : > { %v1401_v56 = vadd.f32 1.0, %v1128_v53  ;;  %v1130_v58 = vpop.eup %1129 }
 0x149   : > { %1131 = vpow2.f32 %v1059_v51  ;;  %v578_v60 = vmul.f32 %v1130_v58, %v1396_v48  ;;  %v570_v17 = vsel %vm1411_vm7, %v1126_v50, %v566_v3  ;;  %vm583_vm10 = vweird.f32 %v1130_v58 }
 0x14a   : > { %1133 = vrcp.f32 %v1401_v56  ;;  %v575_v24 = vsel %vm572_vm8, %v574_v14, %v570_v17  ;;  %vm584_vm11 = vmor %vm582_vm9, %vm583_vm10  ;;  %v603_v43 = vand.u32 2147483648, %v1401_v56  ;;  %vm597_vm14 = vweird.f32 %v1401_v56 }
 0x14b   : > { %v579_v5 = vsub.f32 1.0, %v578_v60  ;;  %v818_v30 = vmul.f32 %v575_v24, %v1304_v7  ;;  %v601_v45 = vand.u32 2147483647, %v1401_v56 }
 0x14c   : > { %v676_v55 = vpop.f32.mrf.mxu3  ;;  %v653_v35 = vpop.f32.mrf.mxu2  ;;  %v604_v48 = vor.u32 1.1754944e-38, %v603_v43 }
 0x14d   : > { %v677_v10 = vadd.f32 %v676_v55, %v644_v52  ;;  %v580_v18 = vmul.f32 %v1130_v58, %v579_v5  ;;  %vm602_vm0 = vcmp.eq.f32.partialorder %v601_v45, 8.507059e+37 }
 0x14f   : > { %v1132_v59 = vpop.eup %1131  ;;  %v581_v26 = vadd.f32 %v1130_v58, %v580_v18 }
 0x150   : > { %v1407_v1 = vadd.f32 1.0, %v1132_v59  ;;  %v1409_v6 = vpop.eup %1133 }
 0x151   : > { %v593_v15 = vmul.f32 %v1409_v6, %v1401_v56  ;;  %v585_v33 = vsel %vm584_vm11, %v1130_v58, %v581_v26  ;;  %vm598_vm13 = vweird.f32 %v1409_v6 }
 0x152   : > { %1135 = vrcp.f32 %v1407_v1  ;;  %v590_v38 = vsel %vm587_vm12, %v589_v36, %v585_v33  ;;  %vm599_vm15 = vmor %vm597_vm14, %vm598_vm13  ;;  %v618_v51 = vand.u32 2147483648, %v1407_v1  ;;  %vm612_vm2 = vweird.f32 %v1407_v1 }
 0x153   : > { %v594_v27 = vsub.f32 1.0, %v593_v15  ;;  %v819_v44 = vmul.f32 %v590_v38, %v1313_v9  ;;  %v616_v53 = vand.u32 2147483647, %v1407_v1 }
 0x154   : > { %v679_v63 = vpop.f32.mrf.mxu3  ;;  %v619_v55 = vor.u32 1.1754944e-38, %v618_v51  ;;  %v888_v59 = vpop.f32.mrf.mxu2 }
 0x155   : > { %v680_v2 = vadd.f32 %v679_v63, %v647_v62  ;;  %v595_v34 = vmul.f32 %v1409_v6, %v594_v27  ;;  %vm617_vm6 = vcmp.eq.f32.partialorder %v616_v53, 8.507059e+37 }
 0x157   : > { %702 = vmatpush.msrb.mxu0 %v680_v2  ;;  %1098 = vmatpush.msrb.mxu1 %v680_v2  ;;  %v596_v41 = vadd.f32 %v1409_v6, %v595_v34 }
 0x158   : > { %v1136_v28 = vpop.eup %1135 }
 0x159   : > { %703 = vmatpush.msrb.mxu0 %v677_v10  ;;  %1099 = vmatpush.msrb.mxu1 %v677_v10  ;;  %v608_v32 = vmul.f32 %v1136_v28, %v1407_v1  ;;  %v600_v46 = vsel %vm599_vm15, %v1409_v6, %v596_v41  ;;  %vm613_vm1 = vweird.f32 %v1136_v28  ;;  %v1119_v10 = vld [vmem:[%s1557_s7] ss:$0 sm:$0xff] }
 0x15a   : > { %1070 = vmatmul.msk.f32.vlgmr.msrb.gmra.mxu1 %vm485_vm4, %v1338_v20  ;;  %1069 = vmatmul.msk.f32.vlgmr.msrb.gmra.mxu0 %vm485_vm4, %v1343_v21  ;;  %v605_v49 = vsel %vm602_vm0, %v604_v48, %v600_v46  ;;  %vm614_vm5 = vmor %vm612_vm2, %vm613_vm1 }
 0x15b   : > { %851 = vmatpush.msra.mxu1 %v826_v12  ;;  %v609_v42 = vsub.f32 1.0, %v608_v32  ;;  %v820_v52 = vmul.f32 %v605_v49, %v1322_v11 }
 0x15c   : > { %v682_v23 = vpop.f32.mrf.mxu3  ;;  %v891_v61 = vpop.f32.mrf.mxu2 }
 0x15d   : > { %852 = vmatpush.msra.mxu1 %v825_v16  ;;  %v683_v39 = vadd.f32 %v682_v23, %v650_v19  ;;  %v610_v47 = vmul.f32 %v1136_v28, %v609_v42 }
 0x15f   : > { %853 = vmatpush.msra.mxu1 %v824_v22  ;;  %v611_v50 = vadd.f32 %v1136_v28, %v610_v47 }
 0x161   : > { %854 = vmatpush.msra.mxu1 %v823_v25  ;;  %v615_v54 = vsel %vm614_vm5, %v1136_v28, %v611_v50 }
 0x162   : > { %1077 = vmatmul.msk.f32.vlgmr.msra.gmra.mxu1 %vm397_vm3, %v818_v30  ;;  %v620_v56 = vsel %vm617_vm6, %v619_v55, %v615_v54 }
 0x163   : > { %v821_v57 = vmul.f32 %v620_v56, %v1331_v13 }
 0x164   : > { %v685_v37 = vpop.f32.mrf.mxu3  ;;  %v894_v1 = vpop.f32.mrf.mxu2 }
 0x165   : > { %v686_v40 = vadd.f32 %v685_v37, %v653_v35 }
 0x167   : > { %725 = vmatpush.msra.mxu0 %v686_v40  ;;  %v1486_v40 = vld [vmem:[%s1560_s10] ss:$0 sm:$0xff] }
 0x169   : > { %726 = vmatpush.msra.mxu0 %v683_v39 }
 0x16a   : > { %1078 = vmatmul.msk.f32.gmra.mxu1 %vm397_vm3, %v819_v44  ;;  %1071 = vmatmul.msk.f32.vlgmr.msra.gmra.mxu0 %vm485_vm4, %v1343_v21 }
 0x16c   : > { %v897_v3 = vpop.f32.mrf.mxu2 }
 0x172   : > { %1079 = vmatmul.msk.f32.gmra.mxu1 %vm397_vm3, %v820_v52  ;;  %1072 = vmatmul.msk.f32.gmra.mxu0 %vm485_vm4, %v1338_v20 }
 0x17a   : > { %1080 = vmatmul.msk.f32.gmra.mxu1 %vm397_vm3, %v821_v57 }
 0x1d7   : > { %v708_v58 = vpop.f32.mrf.mxu1  ;;  %v705_v8 = vpop.f32.mrf.mxu0 }
 0x1d8   : > { %v738_v12 = vadd.f32 %v1119_v10, %v705_v8  ;;  %v739_v16 = vadd.f32 %v1119_v10, %v708_v58 }
 0x1da   : > { %v1073_v14 = vmul.f32 -1.442695, %v738_v12  ;;  %v1074_v18 = vmul.f32 -1.442695, %v739_v16 }
 0x1dc   : > { %1137 = vpow2.f32 %v1073_v14 }
 0x1dd   : > { %1139 = vpow2.f32 %v1074_v18 }
 0x1df   : > { %v856_v60 = vpop.f32.mrf.mxu1 }
 0x1e0   : > { %v889_v0 = vadd.f32 %v888_v59, %v856_v60 }
 0x1e2   : > { %v1138_v19 = vpop.eup %1137 }
 0x1e7   : > { %v859_v62 = vpop.f32.mrf.mxu1  ;;  %v728_v15 = vpop.f32.mrf.mxu0 }
 0x1e8   : > { %v892_v63 = vadd.f32 %v891_v61, %v859_v62  ;;  %v740_v17 = vadd.f32 %v1119_v10, %v728_v15 }
 0x1ea   : > { %914 = vmatpush.msrb.mxu3 %v892_v63  ;;  %v1075_v22 = vmul.f32 -1.442695, %v740_v17 }
 0x1ec   : > { %915 = vmatpush.msrb.mxu3 %v889_v0  ;;  %1141 = vpow2.f32 %v1075_v22 }
 0x1ed   : > { %1086 = vmatmul.msk.f32.vlgmr.msrb.gmra.mxu3 %vm485_vm4, %v1343_v21 }
 0x1ef   : > { %v862_v2 = vpop.f32.mrf.mxu1  ;;  %v731_v23 = vpop.f32.mrf.mxu0 }
 0x1f0   : > { %v895_v6 = vadd.f32 %v894_v1, %v862_v2  ;;  %v741_v24 = vadd.f32 %v1119_v10, %v731_v23 }
 0x1f2   : > { %v1076_v25 = vmul.f32 -1.442695, %v741_v24 }
 0x1f5   : > { %1087 = vmatmul.msk.f32.gmra.mxu3 %vm485_vm4, %v1338_v20 }
 0x1f7   : > { %v865_v4 = vpop.f32.mrf.mxu1 }
 0x1f8   : > { %v898_v5 = vadd.f32 %v897_v3, %v865_v4 }
 0x1fa   : > { %937 = vmatpush.msrb.mxu0 %v898_v5 }
 0x1fc   : > { %938 = vmatpush.msrb.mxu0 %v895_v6 }
 0x1fd   : > { %1088 = vmatmul.msk.f32.vlgmr.msrb.gmra.mxu0 %vm485_vm4, %v1343_v21  ;;  %v754_v21 = vadd.f32 1.0, %v1138_v19 }
 0x1ff   : > { %1143 = vrcp.f32 %v754_v21  ;;  %v769_v39 = vand.u32 2147483648, %v754_v21  ;;  %v767_v43 = vand.u32 2147483647, %v754_v21 }
 0x200   : > { %1145 = vpow2.f32 %v1076_v25 }
 0x201   : > { %v770_v47 = vor.u32 1.1754944e-38, %v769_v39  ;;  %vm768_vm9 = vcmp.eq.f32.partialorder %v767_v43, 8.507059e+37 }
 0x205   : > { %1089 = vmatmul.msk.f32.gmra.mxu0 %vm485_vm4, %v1338_v20  ;;  %v1140_v20 = vpop.eup %1139  ;;  %vm763_vm4 = vweird.f32 %v754_v21 }
 0x206   : > { %v1142_v26 = vpop.eup %1141  ;;  %v755_v27 = vadd.f32 1.0, %v1140_v20 }
 0x207   : > { %v1144_v28 = vpop.eup %1143  ;;  %v1473_v29 = vadd.f32 1.0, %v1142_v26 }
 0x208   : > { %1147 = vrcp.f32 %v755_v27  ;;  %v759_v30 = vmul.f32 %v1144_v28, %v754_v21  ;;  %v1146_v31 = vpop.eup %1145  ;;  %vm764_vm7 = vweird.f32 %v1144_v28  ;;  %v782_v55 = vand.u32 2147483647, %v755_v27 }
 0x209   : > { %1149 = vrcp.f32 %v1473_v29  ;;  %v1476_v34 = vadd.f32 1.0, %v1146_v31  ;;  %vm765_vm8 = vmor %vm763_vm4, %vm764_vm7  ;;  %vm793_vm11 = vweird.f32 %v1473_v29  ;;  %vm778_vm13 = vweird.f32 %v755_v27 }
 0x20a   : > { %v760_v32 = vsub.f32 1.0, %v759_v30  ;;  %v784_v56 = vand.u32 2147483648, %v755_v27  ;;  %v799_v57 = vand.u32 2147483648, %v1473_v29  ;;  %v797_v63 = vand.u32 2147483647, %v1473_v29 }
 0x20b   : > { %1151 = vrcp.f32 %v1476_v34  ;;  %vm783_vm0 = vcmp.eq.f32.partialorder %v782_v55, 8.507059e+37  ;;  %vm808_vm2 = vweird.f32 %v1476_v34  ;;  %v814_v17 = vand.u32 2147483648, %v1476_v34 }
 0x20c   : > { %v761_v37 = vmul.f32 %v1144_v28, %v760_v32  ;;  %v785_v8 = vor.u32 1.1754944e-38, %v784_v56  ;;  %v800_v10 = vor.u32 1.1754944e-38, %v799_v57  ;;  %vm798_vm1 = vcmp.eq.f32.partialorder %v797_v63, 8.507059e+37 }
 0x20d   : > { %v812_v23 = vand.u32 2147483647, %v1476_v34  ;;  %v815_v30 = vor.u32 1.1754944e-38, %v814_v17 }
 0x20e   : > { %v1148_v33 = vpop.eup %1147  ;;  %v762_v42 = vadd.f32 %v1144_v28, %v761_v37 }
 0x20f   : > { %v1478_v35 = vpop.eup %1149  ;;  %v774_v36 = vmul.f32 %v1148_v33, %v755_v27  ;;  %vm779_vm10 = vweird.f32 %v1148_v33  ;;  %vm813_vm4 = vcmp.eq.f32.partialorder %v812_v23, 8.507059e+37 }
 0x210   : > { %v789_v38 = vmul.f32 %v1478_v35, %v1473_v29  ;;  %v766_v50 = vsel %vm765_vm8, %v1144_v28, %v762_v42  ;;  %vm794_vm12 = vweird.f32 %v1478_v35  ;;  %vm1497_vm14 = vmor %vm778_vm13, %vm779_vm10 }
 0x211   : > { %v775_v41 = vsub.f32 1.0, %v774_v36  ;;  %v1488_v46 = vpop.eup %1151  ;;  %v771_v53 = vsel %vm768_vm9, %v770_v47, %v766_v50  ;;  %vm1506_vm15 = vmor %vm793_vm11, %vm794_vm12 }
 0x212   : > { %v790_v45 = vsub.f32 1.0, %v789_v38  ;;  %v804_v52 = vmul.f32 %v1488_v46, %v1476_v34  ;;  %v962_v58 = vsub.f32 1.0, %v771_v53  ;;  %v958_v3 = vmul.f32 %v771_v53, %v1304_v7 }
 0x213   : > { %v776_v49 = vmul.f32 %v1148_v33, %v775_v41  ;;  %vm809_vm5 = vweird.f32 %v1488_v46 }
 0x214   : > { %v791_v51 = vmul.f32 %v1478_v35, %v790_v45  ;;  %v805_v61 = vsub.f32 1.0, %v804_v52  ;;  %vm1524_vm6 = vmor %vm808_vm2, %vm809_vm5 }
 0x215   : > { %v777_v54 = vadd.f32 %v1148_v33, %v776_v49 }
 0x216   : > { %v792_v62 = vadd.f32 %v1478_v35, %v791_v51  ;;  %v806_v15 = vmul.f32 %v1488_v46, %v805_v61 }
 0x217   : > { %v781_v5 = vsel %vm1497_vm14, %v1148_v33, %v777_v54 }
 0x218   : > { %v796_v16 = vsel %vm1506_vm15, %v1478_v35, %v792_v62  ;;  %v786_v7 = vsel %vm783_vm0, %v785_v8, %v781_v5  ;;  %v807_v22 = vadd.f32 %v1488_v46, %v806_v15 }
 0x219   : > { %v801_v18 = vsel %vm798_vm1, %v800_v10, %v796_v16  ;;  %v963_v19 = vsub.f32 1.0, %v786_v7  ;;  %v959_v20 = vmul.f32 %v786_v7, %v1313_v9 }
 0x21a   : > { %v964_v26 = vsub.f32 1.0, %v801_v18  ;;  %v960_v29 = vmul.f32 %v801_v18, %v1322_v11  ;;  %v811_v34 = vsel %vm1524_vm6, %v1488_v46, %v807_v22 }
 0x21b   : > { %v816_v35 = vsel %vm813_vm4, %v815_v30, %v811_v34 }
 0x21c   : > { %v965_v36 = vsub.f32 1.0, %v816_v35  ;;  %v961_v11 = vmul.f32 %v816_v35, %v1331_v13 }
 0x270   : > { %v917_v44 = vpop.f32.mrf.mxu3 }
 0x271   : > { %v950_v48 = vadd.f32 %v1486_v40, %v917_v44 }
 0x273   : > { %1153 = vtanh.f32 %v950_v48 }
 0x278   : > { %v920_v60 = vpop.f32.mrf.mxu3 }
 0x279   : > { %v1154_v0 = vpop.eup %1153  ;;  %v951_v1 = vadd.f32 %v1486_v40, %v920_v60 }
 0x27a   : > { %v966_v4 = vmul.f32 %v1154_v0, %v962_v58  ;;  %v940_v6 = vpop.f32.mrf.mxu0 }
 0x27b   : > { %1155 = vtanh.f32 %v951_v1  ;;  %v952_v12 = vadd.f32 %v1486_v40, %v940_v6 }
 0x27c   : > { %v970_v14 = vadd.f32 %v966_v4, %v958_v3 }
 0x27d   : > { %1157 = vtanh.f32 %v952_v12 }
 0x27e   : > { %974 = vst.msk [vmem:[#allocation2] sm:$0xff] %vm397_vm3, %v970_v14 }
 0x281   : > { %v1156_v21 = vpop.eup %1155 }
 0x282   : > { %v967_v25 = vmul.f32 %v1156_v21, %v963_v19  ;;  %v943_v27 = vpop.f32.mrf.mxu0 }
 0x283   : > { %v1158_v28 = vpop.eup %1157  ;;  %v953_v31 = vadd.f32 %v1486_v40, %v943_v27 }
 0x284   : > { %v971_v32 = vadd.f32 %v967_v25, %v959_v20  ;;  %v968_v33 = vmul.f32 %v1158_v28, %v964_v26 }
 0x285   : > { %1159 = vtanh.f32 %v953_v31 }
 0x286   : > { %975 = vst.msk [vmem:[#allocation2 + $0x8] sm:$0xff] %vm397_vm3, %v971_v32  ;;  %v972_v9 = vadd.f32 %v968_v33, %v960_v29 }
 0x288   : > { %976 = vst.msk [vmem:[#allocation2 + $0x10] sm:$0xff] %vm397_vm3, %v972_v9 }
 0x28b   : > { %v1160_v37 = vpop.eup %1159 }
 0x28c   : > { %v969_v38 = vmul.f32 %v1160_v37, %v965_v36  ;;  %981 = sbr.rel (%p1090_p5) target bundleno = 661 (0x295), region = 72 }
 0x28e   : > { %v973_v39 = vadd.f32 %v969_v38, %v961_v11 }
 0x290   : > { %977 = vst.msk [vmem:[#allocation2 + $0x18] sm:$0xff] %vm397_vm3, %v973_v39 }
 0x291   : > { %982 = vst.msk [vmem:[#allocation3] sm:$0xff] %vm397_vm3, %v970_v14 }
 0x292   : > { %983 = vst.msk [vmem:[#allocation3 + $0x8] sm:$0xff] %vm397_vm3, %v971_v32 }
 0x293   : > { %984 = vst.msk [vmem:[#allocation3 + $0x10] sm:$0xff] %vm397_vm3, %v972_v9 }
 0x294   : > { %985 = vst.msk [vmem:[#allocation3 + $0x18] sm:$0xff] %vm397_vm3, %v973_v39 }
 0x295 PF: > { %p1104_p6 = scmp.eq.s32.totalorder %s1271_s18, 7  ;;  %s1202_s30 = smov [#allocation3]  }
 0x296   : > { %s991_s12 = sshll.u32 %s1202_s30, 4  ;;  %s993_s15 = sshll.u32 %s1561_s11, 4  ;;  %s992_s12 = int_to_ptr.vmem [resolvable:$true] %s991_s12  ;;  %s994_s15 = int_to_ptr.hbm [resolvable:$true] %s993_s15 }
 0x297   : > { %s1203_s16 = smov 128   ;;  %s1204_s19 = smov 8  }
 0x298   : > { %1101 = dma.vmem_to_hbm [thread:$0]  (%p1104_p6), %s992_s12, 512, %s994_s15, [#allocation4], %s1203_s16, %s1203_s16, %s1204_s19  }
 0x299   : > { %1194 = dma.done.wait (%p1104_p6), [#allocation4], 512  }
 0x29a   : > { %1196 = vsyncadd (%p1104_p6), [#allocation4], 4294966784 }
 0x29b PF: > { %s22_s17 = sadd.s32 1, %s1199_s17  }
 0x29c   : > { %p19_p7 = scmp.ge.s32.totalorder %s22_s17, 10  }
 0x29e   :  { %21 = sbr.rel (!%p19_p7) target bundleno = 1 (0x1), region = 99 }
 0x2a3   :  { %1010 = vsyncpa [#allocation4], 1 }
 0x2a4   :  { %1012 = vsyncpa [#allocation4 + $0x1], 1 }

</bundles_post_ra>
